<compile_context>
chip_gen: v7x
topology: tpu7x:2x2x1
jax: 0.10.0
libtpu: 0.0.40
codegen_flags: <defaults>
</compile_context>

<pallas_src>
import functools

import numpy as np
import jax
import jax.numpy as jnp
from jax import lax
from jax.experimental import pallas as pl
from jax.experimental.pallas import tpu as pltpu

_LANES = 128


def _cdiv(a, b):
    return -(-a // b)


def _round_up(x, m):
    return _cdiv(x, m) * m


def _vmem_capacity_bytes():
    """Physical VMEM of the current chip (fallback: 64 MiB, v7x-safe)."""
    try:
        info = pltpu.get_tpu_info()
        cap = getattr(info, "vmem_capacity_bytes", None)
        if cap:
            return int(cap)
    except Exception:
        pass
    return 64 << 20


# Dtypes the kernel can stream natively (cast to f32 happens inside the kernel).
_NATIVE_DTYPES = (jnp.float32, jnp.bfloat16, jnp.int8, jnp.uint8, jnp.int32)


def _prep_input(x, n):
    """Flatten to (N, M); keep DMA-friendly native dtypes, else cast to f32 once."""
    x = x.reshape(n, -1)
    if not any(x.dtype == d for d in _NATIVE_DTYPES):
        x = x.astype(jnp.float32)
    return x


# ----------------------------------------------------------------------------
# Kernel: fused per-batch sums of segment, label and segment*label.
# ----------------------------------------------------------------------------
def _make_dice_kernel(n_inner, cb, midc, needs_mask):
    def kernel(seg_ref, lab_ref, out_ref, acc_seg, acc_lab, acc_int):
        o = pl.program_id(1)          # outer chunk half ("parallel" -> megacore)
        i = pl.program_id(2)          # inner chunk index (reduction, "arbitrary")

        @pl.when(i == 0)
        def _init():
            acc_seg[...] = jnp.zeros_like(acc_seg)
            acc_lab[...] = jnp.zeros_like(acc_lab)
            acc_int[...] = jnp.zeros_like(acc_int)

        # Native-dtype DMA; cast to f32 only once the block is in VMEM.
        seg = seg_ref[...].astype(jnp.float32)      # (bn, cb, 128)
        lab = lab_ref[...].astype(jnp.float32)

        if needs_mask:
            # The last chunk (or a clamped duplicate chunk from the outer split)
            # may extend past the real extent: zero every chunk-row >= midc.
            rem = midc - (o * n_inner + i) * cb
            row = lax.broadcasted_iota(jnp.int32, seg.shape, 1)
            valid = row < rem
            seg = jnp.where(valid, seg, 0.0)
            lab = jnp.where(valid, lab, 0.0)

        # Fold only the chunk (sublane) axis; defer the cross-lane reduce.
        acc_seg[...] += jnp.sum(seg, axis=1)
        acc_lab[...] += jnp.sum(lab, axis=1)
        acc_int[...] += jnp.sum(seg * lab, axis=1)

        @pl.when(i == n_inner - 1)
        def _finalize():
            out_ref[0, 0, :] = jnp.sum(acc_seg[...], axis=-1)
            out_ref[0, 1, :] = jnp.sum(acc_lab[...], axis=-1)
            out_ref[0, 2, :] = jnp.sum(acc_int[...], axis=-1)

    return kernel


# ----------------------------------------------------------------------------
# Tile selection: bound the real (batch x chunk x 128) footprint.
# ----------------------------------------------------------------------------
def _choose_tiles(n, midc, itemsizes, pair_budget):
    # Sublane alignment of the chunk axis per packed dtype: 8 f32, 16 bf16, 32 i8.
    align = max(8, max(32 // isz for isz in itemsizes))

    def pair_row_bytes(bn):
        # Bytes of ONE chunk row (128 lanes) of both inputs for bn batch rows.
        return sum(bn * _LANES * isz for isz in itemsizes)

    bn = n
    if n > 8 and pair_row_bytes(n) * align > pair_budget:
        # Extreme batch sizes: split the batch over the grid.  Multiples of 128
        # keep the (1, 3, bn) output block legal when bn != N.
        bn = max(128, (pair_budget // (pair_row_bytes(1) * align)) // 128 * 128)
        bn = min(bn, _round_up(n, 128))
    nb = _cdiv(n, bn)

    cb_max = max(align, (pair_budget // pair_row_bytes(bn)) // align * align)
    if cb_max >= midc:
        cb = midc                      # single, exactly-covering chunk
        num_chunks = 1
    else:
        num_chunks = _cdiv(midc, cb_max)
        cb = min(midc, _round_up(_cdiv(midc, num_chunks), align))  # balanced
        num_chunks = _cdiv(midc, cb)
    return bn, nb, cb, num_chunks


# ----------------------------------------------------------------------------
# Host-side wrapper.
# ----------------------------------------------------------------------------
def dice_loss(segment, label, return_dice=False, pair_budget_bytes=None):
    """Dice loss matching the PyTorch DiceLoss.forward semantics.

    segment, label: arrays of shape (N, ...); trailing dims are flattened.
    pair_budget_bytes: optional override of the combined per-step input-block
    budget (used in tests to exercise the multi-chunk / masked / megacore path).
    """
    n = segment.shape[0]
    seg = _prep_input(segment, n)
    lab = _prep_input(label, n)
    m = seg.shape[1]
    assert lab.shape[1] == m, "segment and label must have the same element count"

    midc = _cdiv(m, _LANES)            # number of 128-lane groups per row
    m_pad = midc * _LANES
    if m_pad != m:
        # Ragged tail: pad only to the next 128-lane boundary (<= 127 elems/row).
        # Zeros do not change any of the three sums; the per-chunk rounding pad
        # of the previous version (up to ~2x extra bytes) is gone — partial last
        # chunks are masked in-kernel instead.
        seg = jnp.pad(seg, ((0, 0), (0, m_pad - m)))
        lab = jnp.pad(lab, ((0, 0), (0, m_pad - m)))
    seg3 = seg.reshape(n, midc, _LANES)
    lab3 = lab.reshape(n, midc, _LANES)

    itemsizes = (seg.dtype.itemsize, lab.dtype.itemsize)

    # Generation-aware VMEM budget: ~8 MiB/input block on 128 MiB parts
    # (v5e/v6e), ~6 MiB/input on 64 MiB parts (v7x); explicit scoped-VMEM limit.
    phys_vmem = _vmem_capacity_bytes()
    if pair_budget_bytes is not None:
        pair_budget = int(pair_budget_bytes)
    elif phys_vmem >= (128 << 20):
        pair_budget = 16 << 20
    else:
        pair_budget = 12 << 20
    vmem_limit = int(max(32 << 20,
                         min(phys_vmem - (16 << 20),
                             2 * pair_budget + (16 << 20))))

    bn, nb, cb, num_chunks = _choose_tiles(n, midc, itemsizes, pair_budget)
    n_outer = 2 if num_chunks >= 8 else 1          # 2-way split -> v7x megacore
    n_inner = _cdiv(num_chunks, n_outer)
    needs_mask = (n_outer * n_inner * cb) > midc
    last_chunk = num_chunks - 1

    def in_map(b, o, i):
        # Clamp so grid-padding steps re-read the last chunk (then fully masked).
        return (b, jnp.minimum(o * n_inner + i, last_chunk), 0)

    def out_map(b, o, i):
        return (o, 0, b)

    kernel = _make_dice_kernel(n_inner, cb, midc, needs_mask)

    partials = pl.pallas_call(
        kernel,
        out_shape=jax.ShapeDtypeStruct((n_outer, 3, n), jnp.float32),
        grid=(nb, n_outer, n_inner),
        in_specs=[
            pl.BlockSpec((bn, cb, _LANES), in_map),
            pl.BlockSpec((bn, cb, _LANES), in_map),
        ],
        out_specs=pl.BlockSpec((1, 3, bn), out_map),
        scratch_shapes=[
            pltpu.VMEM((bn, _LANES), jnp.float32),
            pltpu.VMEM((bn, _LANES), jnp.float32),
            pltpu.VMEM((bn, _LANES), jnp.float32),
        ],
        compiler_params=pltpu.CompilerParams(
            dimension_semantics=("parallel", "parallel", "arbitrary"),
            vmem_limit_bytes=vmem_limit,
        ),
    )(seg3, lab3)

    sums = jnp.sum(partials, axis=0)               # (3, N)
    seg_sum, lab_sum, inter = sums[0], sums[1], sums[2]
    dice = (2.0 * inter + 0.001) / (seg_sum + lab_sum + 0.001)
    dice_mean = jnp.mean(dice)
    return dice_mean if return_dice else 1.0 - dice_mean


# ----------------------------------------------------------------------------
# Pure-JAX reference for validation.
# ----------------------------------------------------------------------------
def _dice_loss_ref(segment, label, return_dice=False):
    n = segment.shape[0]
    s = segment.reshape(n, -1).astype(jnp.float32)
    l = label.reshape(n, -1).astype(jnp.float32)
    inter = jnp.sum(s * l, axis=1)
    dice = (2.0 * inter + 0.001) / (jnp.sum(s, axis=1) + jnp.sum(l, axis=1) + 0.001)
    return jnp.mean(dice) if return_dice else 1.0 - jnp.mean(dice)


if __name__ == "__main__":
    key = jax.random.PRNGKey(0)
    k1, k2, k3, k4, k5, k6, k7, k8 = jax.random.split(key, 8)

    loss_fn = jax.jit(functools.partial(dice_loss, return_dice=False))
    dice_fn = jax.jit(functools.partial(dice_loss, return_dice=True))

    # 1) Small aligned case, matching typical module usage (B, C, H, W).
    seg = jax.random.uniform(k1, (2, 4, 16, 16), dtype=jnp.float32)
    lab = (jax.random.uniform(k2, (2, 4, 16, 16)) > 0.5).astype(jnp.float32)
    loss = loss_fn(seg, lab)
    jax.block_until_ready(loss)
    np.testing.assert_allclose(np.asarray(loss),
                               np.asarray(_dice_loss_ref(seg, lab, False)),
                               rtol=1e-4, atol=1e-6)
    dice = dice_fn(seg, lab)
    jax.block_until_ready(dice)
    np.testing.assert_allclose(np.asarray(dice),
                               np.asarray(_dice_loss_ref(seg, lab, True)),
                               rtol=1e-4, atol=1e-6)

    # 2) Unaligned volume (exercises the minimal <128-element tail handling).
    seg2 = jax.random.uniform(k3, (3, 2, 17, 19, 23), dtype=jnp.float32)
    lab2 = (jax.random.uniform(k4, (3, 2, 17, 19, 23)) > 0.5).astype(jnp.float32)
    loss2 = loss_fn(seg2, lab2)
    jax.block_until_ready(loss2)
    np.testing.assert_allclose(np.asarray(loss2),
                               np.asarray(_dice_loss_ref(seg2, lab2, False)),
                               rtol=1e-4, atol=1e-6)

    # 3) Native bf16 inputs: no wrapper f32 copy, cast happens inside the kernel.
    seg3 = jax.random.uniform(k5, (2, 3, 33, 31), dtype=jnp.float32).astype(jnp.bfloat16)
    lab3 = (jax.random.uniform(k6, (2, 3, 33, 31)) > 0.5).astype(jnp.bfloat16)
    loss3 = loss_fn(seg3, lab3)
    jax.block_until_ready(loss3)
    np.testing.assert_allclose(np.asarray(loss3),
                               np.asarray(_dice_loss_ref(seg3, lab3, False)),
                               rtol=1e-4, atol=1e-6)

    # 4) Tiny block-budget override: multi-chunk grid, masked partial last chunk
    #    and the 2-way "parallel" outer split (megacore path on v7x).
    small_fn = jax.jit(functools.partial(dice_loss, return_dice=False,
                                         pair_budget_bytes=8192))
    seg4 = jax.random.uniform(k7, (2, 4, 36, 60), dtype=jnp.float32)
    lab4 = (jax.random.uniform(k8, (2, 4, 36, 60)) > 0.5).astype(jnp.float32)
    loss4 = small_fn(seg4, lab4)
    jax.block_until_ready(loss4)
    np.testing.assert_allclose(np.asarray(loss4),
                               np.asarray(_dice_loss_ref(seg4, lab4, False)),
                               rtol=1e-4, atol=1e-6)

    print("KERNEL_OK")
</pallas_src>

<mosaic_0001>
module attributes {stable_mosaic.version = 11 : i64} {
  func.func @kernel(%arg0: i32, %arg1: i32, %arg2: i32, %arg3: memref<2x8x128xf32, #tpu.memory_space<vmem>>, %arg4: memref<2x8x128xf32, #tpu.memory_space<vmem>>, %arg5: memref<1x3x2xf32, #tpu.memory_space<vmem>>, %arg6: memref<2x128xf32, #tpu.memory_space<vmem>>, %arg7: memref<2x128xf32, #tpu.memory_space<vmem>>, %arg8: memref<2x128xf32, #tpu.memory_space<vmem>>) attributes {dimension_semantics = [#tpu.dimension_semantics<parallel>, #tpu.dimension_semantics<parallel>, #tpu.dimension_semantics<arbitrary>], iteration_bounds = array<i64: 1, 1, 1>, scalar_prefetch = 0 : i64, scratch_operands = 3 : i64, tpu.core_type = #tpu.core_type<tc>, window_params = [{transform_indices = @transform_0, window_bounds = array<i64: 2, 8, 128>}, {transform_indices = @transform_1, window_bounds = array<i64: 2, 8, 128>}, {transform_indices = @transform_2, window_bounds = array<i64: 1, 3, 2>}]} {
    %c0_i32 = arith.constant 0 : i32
    %0 = arith.cmpi eq, %arg2, %c0_i32 : i32
    %1 = arith.extui %0 : i1 to i32
    %c0_i32_0 = arith.constant 0 : i32
    %2 = arith.cmpi ne, %1, %c0_i32_0 : i32
    scf.if %2 {
      %cst_22 = arith.constant 0.000000e+00 : f32
      %21 = vector.broadcast %cst_22 : f32 to vector<2x128xf32>
      %c0_23 = arith.constant 0 : index
      %c0_24 = arith.constant 0 : index
      %22 = vector.load %arg6[%c0_23, %c0_24] : memref<2x128xf32, #tpu.memory_space<vmem>>, vector<2x128xf32>
      tpu.vector_store %arg6[%c0_23, %c0_24], %21 {strides = array<i32>} : memref<2x128xf32, #tpu.memory_space<vmem>>, vector<2x128xf32>,
      %cst_25 = arith.constant 0.000000e+00 : f32
      %23 = vector.broadcast %cst_25 : f32 to vector<2x128xf32>
      %c0_26 = arith.constant 0 : index
      %c0_27 = arith.constant 0 : index
      %24 = vector.load %arg7[%c0_26, %c0_27] : memref<2x128xf32, #tpu.memory_space<vmem>>, vector<2x128xf32>
      tpu.vector_store %arg7[%c0_26, %c0_27], %23 {strides = array<i32>} : memref<2x128xf32, #tpu.memory_space<vmem>>, vector<2x128xf32>,
      %cst_28 = arith.constant 0.000000e+00 : f32
      %25 = vector.broadcast %cst_28 : f32 to vector<2x128xf32>
      %c0_29 = arith.constant 0 : index
      %c0_30 = arith.constant 0 : index
      %26 = vector.load %arg8[%c0_29, %c0_30] : memref<2x128xf32, #tpu.memory_space<vmem>>, vector<2x128xf32>
      tpu.vector_store %arg8[%c0_29, %c0_30], %25 {strides = array<i32>} : memref<2x128xf32, #tpu.memory_space<vmem>>, vector<2x128xf32>,
    } else {
    }
    %c0 = arith.constant 0 : index
    %c0_1 = arith.constant 0 : index
    %c0_2 = arith.constant 0 : index
    %3 = vector.load %arg3[%c0, %c0_1, %c0_2] : memref<2x8x128xf32, #tpu.memory_space<vmem>>, vector<2x8x128xf32>
    %c0_3 = arith.constant 0 : index
    %c0_4 = arith.constant 0 : index
    %c0_5 = arith.constant 0 : index
    %4 = vector.load %arg4[%c0_3, %c0_4, %c0_5] : memref<2x8x128xf32, #tpu.memory_space<vmem>>, vector<2x8x128xf32>
    %c0_6 = arith.constant 0 : index
    %c0_7 = arith.constant 0 : index
    %5 = vector.load %arg6[%c0_6, %c0_7] : memref<2x128xf32, #tpu.memory_space<vmem>>, vector<2x128xf32>
    %cst = arith.constant dense<0.000000e+00> : vector<2x128xf32>
    %6 = vector.multi_reduction <add>, %3, %cst [1] : vector<2x8x128xf32> to vector<2x128xf32>
    %7 = arith.addf %5, %6 : vector<2x128xf32>
    %c0_8 = arith.constant 0 : index
    %c0_9 = arith.constant 0 : index
    %8 = vector.load %arg6[%c0_8, %c0_9] : memref<2x128xf32, #tpu.memory_space<vmem>>, vector<2x128xf32>
    tpu.vector_store %arg6[%c0_8, %c0_9], %7 {strides = array<i32>} : memref<2x128xf32, #tpu.memory_space<vmem>>, vector<2x128xf32>,
    %c0_10 = arith.constant 0 : index
    %c0_11 = arith.constant 0 : index
    %9 = vector.load %arg7[%c0_10, %c0_11] : memref<2x128xf32, #tpu.memory_space<vmem>>, vector<2x128xf32>
    %cst_12 = arith.constant dense<0.000000e+00> : vector<2x128xf32>
    %10 = vector.multi_reduction <add>, %4, %cst_12 [1] : vector<2x8x128xf32> to vector<2x128xf32>
    %11 = arith.addf %9, %10 : vector<2x128xf32>
    %c0_13 = arith.constant 0 : index
    %c0_14 = arith.constant 0 : index
    %12 = vector.load %arg7[%c0_13, %c0_14] : memref<2x128xf32, #tpu.memory_space<vmem>>, vector<2x128xf32>
    tpu.vector_store %arg7[%c0_13, %c0_14], %11 {strides = array<i32>} : memref<2x128xf32, #tpu.memory_space<vmem>>, vector<2x128xf32>,
    %c0_15 = arith.constant 0 : index
    %c0_16 = arith.constant 0 : index
    %13 = vector.load %arg8[%c0_15, %c0_16] : memref<2x128xf32, #tpu.memory_space<vmem>>, vector<2x128xf32>
    %14 = arith.mulf %3, %4 : vector<2x8x128xf32>
    %cst_17 = arith.constant dense<0.000000e+00> : vector<2x128xf32>
    %15 = vector.multi_reduction <add>, %14, %cst_17 [1] : vector<2x8x128xf32> to vector<2x128xf32>
    %16 = arith.addf %13, %15 : vector<2x128xf32>
    %c0_18 = arith.constant 0 : index
    %c0_19 = arith.constant 0 : index
    %17 = vector.load %arg8[%c0_18, %c0_19] : memref<2x128xf32, #tpu.memory_space<vmem>>, vector<2x128xf32>
    tpu.vector_store %arg8[%c0_18, %c0_19], %16 {strides = array<i32>} : memref<2x128xf32, #tpu.memory_space<vmem>>, vector<2x128xf32>,
    %c0_i32_20 = arith.constant 0 : i32
    %18 = arith.cmpi eq, %arg2, %c0_i32_20 : i32
    %19 = arith.extui %18 : i1 to i32
    %c0_i32_21 = arith.constant 0 : i32
    %20 = arith.cmpi ne, %19, %c0_i32_21 : i32
    scf.if %20 {
      %c0_22 = arith.constant 0 : index
      %c0_23 = arith.constant 0 : index
      %21 = vector.load %arg6[%c0_22, %c0_23] : memref<2x128xf32, #tpu.memory_space<vmem>>, vector<2x128xf32>
      %cst_24 = arith.constant dense<0.000000e+00> : vector<2xf32>
      %22 = vector.multi_reduction <add>, %21, %cst_24 [1] : vector<2x128xf32> to vector<2xf32>
      %c0_25 = arith.constant 0 : index
      %c0_26 = arith.constant 0 : index
      %c0_27 = arith.constant 0 : index
      %23 = vector.load %arg5[%c0_25, %c0_26, %c0_27] : memref<1x3x2xf32, #tpu.memory_space<vmem>>, vector<1x1x2xf32>
      %24 = vector.shape_cast %23 : vector<1x1x2xf32> to vector<2xf32>
      %25 = vector.shape_cast %22 : vector<2xf32> to vector<1x1x2xf32>
      tpu.vector_store %arg5[%c0_25, %c0_26, %c0_27], %25 {strides = array<i32>} : memref<1x3x2xf32, #tpu.memory_space<vmem>>, vector<1x1x2xf32>,
      %c0_28 = arith.constant 0 : index
      %c0_29 = arith.constant 0 : index
      %26 = vector.load %arg7[%c0_28, %c0_29] : memref<2x128xf32, #tpu.memory_space<vmem>>, vector<2x128xf32>
      %cst_30 = arith.constant dense<0.000000e+00> : vector<2xf32>
      %27 = vector.multi_reduction <add>, %26, %cst_30 [1] : vector<2x128xf32> to vector<2xf32>
      %c0_31 = arith.constant 0 : index
      %c1 = arith.constant 1 : index
      %c0_32 = arith.constant 0 : index
      %28 = vector.load %arg5[%c0_31, %c1, %c0_32] : memref<1x3x2xf32, #tpu.memory_space<vmem>>, vector<1x1x2xf32>
      %29 = vector.shape_cast %28 : vector<1x1x2xf32> to vector<2xf32>
      %30 = vector.shape_cast %27 : vector<2xf32> to vector<1x1x2xf32>
      tpu.vector_store %arg5[%c0_31, %c1, %c0_32], %30 {strides = array<i32>} : memref<1x3x2xf32, #tpu.memory_space<vmem>>, vector<1x1x2xf32>,
      %c0_33 = arith.constant 0 : index
      %c0_34 = arith.constant 0 : index
      %31 = vector.load %arg8[%c0_33, %c0_34] : memref<2x128xf32, #tpu.memory_space<vmem>>, vector<2x128xf32>
      %cst_35 = arith.constant dense<0.000000e+00> : vector<2xf32>
      %32 = vector.multi_reduction <add>, %31, %cst_35 [1] : vector<2x128xf32> to vector<2xf32>
      %c0_36 = arith.constant 0 : index
      %c2 = arith.constant 2 : index
      %c0_37 = arith.constant 0 : index
      %33 = vector.load %arg5[%c0_36, %c2, %c0_37] : memref<1x3x2xf32, #tpu.memory_space<vmem>>, vector<1x1x2xf32>
      %34 = vector.shape_cast %33 : vector<1x1x2xf32> to vector<2xf32>
      %35 = vector.shape_cast %32 : vector<2xf32> to vector<1x1x2xf32>
      tpu.vector_store %arg5[%c0_36, %c2, %c0_37], %35 {strides = array<i32>} : memref<1x3x2xf32, #tpu.memory_space<vmem>>, vector<1x1x2xf32>,
    } else {
    }
    return
  }
  func.func @transform_0(%arg0: i32, %arg1: i32, %arg2: i32) -> (i32, i32, i32) {
    %c1_i32 = arith.constant 1 : i32
    %0 = arith.muli %arg1, %c1_i32 : i32
    %1 = arith.addi %0, %arg2 : i32
    %c0_i32 = arith.constant 0 : i32
    %2 = arith.minsi %1, %c0_i32 : i32
    %c0_i32_0 = arith.constant 0 : i32
    %c0_i32_1 = arith.constant 0 : i32
    return %arg0, %2, %c0_i32_0 : i32, i32, i32
  }
  func.func @transform_1(%arg0: i32, %arg1: i32, %arg2: i32) -> (i32, i32, i32) {
    %c1_i32 = arith.constant 1 : i32
    %0 = arith.muli %arg1, %c1_i32 : i32
    %1 = arith.addi %0, %arg2 : i32
    %c0_i32 = arith.constant 0 : i32
    %2 = arith.minsi %1, %c0_i32 : i32
    %c0_i32_0 = arith.constant 0 : i32
    %c0_i32_1 = arith.constant 0 : i32
    return %arg0, %2, %c0_i32_0 : i32, i32, i32
  }
  func.func @transform_2(%arg0: i32, %arg1: i32, %arg2: i32) -> (i32, i32, i32) {
    %c0_i32 = arith.constant 0 : i32
    %c0_i32_0 = arith.constant 0 : i32
    return %arg1, %c0_i32, %arg0 : i32, i32, i32
  }
}

</mosaic_0001>

<bundles_post_ra>
// kernel: dice_loss.1
= control target key start
LH: loop header
LB: loop body
LE: loop exit
PB: predicated region body
PF: predicated region fallthrough
CT: control target
= control target key end

     0   :  { %v193_v0 = vmov 0.0   ;;  %vm91_vm0 = vcmask 1041409   ;;  %vm140_vm1 = vcmask 1041408   ;;  %v145_v58 = vlaneseq  ;;  %s233_s0 = inlined_call_operand.vmem [shape: f32[2,8,128], index: 0, kind: input, shape index: {}]   ;;  %s234_s1 = inlined_call_operand.vmem [shape: f32[2,8,128], index: 1, kind: input, shape index: {}]   ;;  %s235_s2 = inlined_call_operand.vmem [shape: f32[1,3,2], index: 2, kind: output, shape index: {}]  }
   0x1   :  { %69 = vst [vmem:[#allocation2] sm:$0x3] %v193_v0  ;;  %v72_v1 = vld [vmem:[%s233_s0] sm:$0xff]  ;;  %v73_v2 = vld [vmem:[%s233_s0 + $0x8] sm:$0xff]  ;;  %70 = vst [vmem:[#allocation3] sm:$0x3] %v193_v0 }
   0x2   :  { %71 = vst [vmem:[#allocation4] sm:$0x3] %v193_v0  ;;  %v74_v3 = vld [vmem:[%s234_s1] sm:$0xff]  ;;  %v77_v4 = vrot.slane %v72_v1, 4  ;;  %v83_v5 = vrot.slane %v73_v2, 4  ;;  %v75_v6 = vld [vmem:[%s234_s1 + $0x8] sm:$0xff] }
   0x3   :  { %v116_v7 = vmul.f32 %v74_v3, %v72_v1  ;;  %v97_v8 = vrot.slane %v74_v3, 4  ;;  %v117_v9 = vmul.f32 %v75_v6, %v73_v2  ;;  %v103_v10 = vrot.slane %v75_v6, 4 }
   0x4   :  { %v78_v11 = vadd.f32 %v77_v4, %v72_v1  ;;  %v84_v12 = vadd.f32 %v83_v5, %v73_v2  ;;  %v146_v59 = vand.u32 127, %v145_v58  ;;  %v148_v60 = vshrl.u32 %v145_v58, 7 }
   0x5   :  { %v118_v13 = vrot.slane %v116_v7, 4  ;;  %v98_v14 = vadd.f32 %v97_v8, %v74_v3  ;;  %v124_v15 = vrot.slane %v117_v9, 4  ;;  %v104_v16 = vadd.f32 %v103_v10, %v75_v6 }
   0x6   :  { %v79_v17 = vrot.slane %v78_v11, 2  ;;  %v85_v18 = vrot.slane %v84_v12, 2  ;;  %v149_v61 = vsub.s32 %v146_v59, %v148_v60  ;;  %vm152_vm2 = vcmask 8192  }
   0x7   :  { %v119_v19 = vadd.f32 %v118_v13, %v116_v7  ;;  %v99_v20 = vrot.slane %v98_v14, 2  ;;  %v125_v21 = vadd.f32 %v124_v15, %v117_v9  ;;  %v105_v22 = vrot.slane %v104_v16, 2 }
   0x8   :  { %v80_v23 = vadd.f32 %v79_v17, %v78_v11  ;;  %v86_v24 = vadd.f32 %v85_v18, %v84_v12  ;;  %v76_v35 = vld [vmem:[#allocation2] sm:$0x3]  ;;  %v96_v41 = vld [vmem:[#allocation3] sm:$0x3] }
   0x9   :  { %v120_v25 = vrot.slane %v119_v19, 2  ;;  %v100_v26 = vadd.f32 %v99_v20, %v98_v14  ;;  %v126_v27 = vrot.slane %v125_v21, 2  ;;  %v106_v28 = vadd.f32 %v105_v22, %v104_v16  ;;  %v115_v46 = vld [vmem:[#allocation4] sm:$0x3] }
   0xa   :  { %v81_v29 = vrot.slane %v80_v23, 1  ;;  %v87_v30 = vrot.slane %v86_v24, 1 }
   0xb   :  { %v121_v31 = vadd.f32 %v120_v25, %v119_v19  ;;  %v101_v32 = vrot.slane %v100_v26, 1  ;;  %v127_v33 = vadd.f32 %v126_v27, %v125_v21  ;;  %v107_v34 = vrot.slane %v106_v28, 1 }
   0xc   :  { %v82_v36 = vadd.f32 %v81_v29, %v80_v23  ;;  %v88_v37 = vadd.f32 %v87_v30, %v86_v24 }
   0xd   :  { %v122_v38 = vrot.slane %v121_v31, 1  ;;  %v102_v39 = vadd.f32 %v101_v32, %v100_v26  ;;  %v128_v40 = vrot.slane %v127_v33, 1  ;;  %v108_v42 = vadd.f32 %v107_v34, %v106_v28 }
   0xe   :  { %v92_v43 = vsel %vm91_vm0, %v88_v37, %v82_v36 }
   0xf   :  { %v123_v44 = vadd.f32 %v122_v38, %v121_v31  ;;  %v94_v45 = vadd.f32 %v92_v43, %v76_v35  ;;  %v129_v47 = vadd.f32 %v128_v40, %v127_v33  ;;  %v111_v48 = vsel %vm91_vm0, %v108_v42, %v102_v39 }
  0x10   :  { %v113_v49 = vadd.f32 %v111_v48, %v96_v41 }
  0x11   :  { %95 = vst [vmem:[#allocation2] sm:$0x3] %v94_v45  ;;  %v132_v50 = vsel %vm91_vm0, %v129_v47, %v123_v44 }
  0x12   :  { %v134_v51 = vadd.f32 %v132_v50, %v115_v46  ;;  %114 = vst [vmem:[#allocation3] sm:$0x3] %v113_v49 }
  0x14   :  { %135 = vst [vmem:[#allocation4] sm:$0x3] %v134_v51 }
  0x18   :  { %v139_v52 = vld [vmem:[#allocation2] sm:$0x3] }
  0x19   :  { %v141_v53 = vsel %vm140_vm1, %v139_v52, 0.0  ;;  %v154_v54 = vld [vmem:[#allocation3] sm:$0x3] }
  0x1a   :  { %142 = vadd.xlane.f32.xlu0 %v141_v53  ;;  %v155_v56 = vsel %vm140_vm1, %v154_v54, 0.0 }
  0x1b   :  { %v165_v55 = vld [vmem:[#allocation4] sm:$0x3] }
  0x1c   :  { %v166_v57 = vsel %vm140_vm1, %v165_v55, 0.0 }
  0x1d   :  { %167 = vadd.xlane.f32.xlu1 %v166_v57 }
  0x1e   :  { %156 = vadd.xlane.f32.xlu0 %v155_v56 }
  0xa7   :  { %v143_v62 = vpop.xlane.xlu0 %142 }
  0xa8   :  { %v150_v63 = vrot.slane %v143_v62, %v149_v61 }
  0xaa   :  { %153 = vst.msk [vmem:[%s235_s2] sm:$0x1] %vm152_vm2, %v150_v63  ;;  %v168_v0 = vpop.xlane.xlu1 %167 }
  0xab   :  { %v173_v1 = vrot.slane %v168_v0, %v149_v61  ;;  %v157_v2 = vpop.xlane.xlu0 %156 }
  0xac   :  { %v162_v3 = vrot.slane %v157_v2, %v149_v61 }
  0xad   :  { %175 = vst.msk [vmem:[%s235_s2 + $0x2] sm:$0x1] %vm152_vm2, %v173_v1 }
  0xae   :  { %164 = vst.msk [vmem:[%s235_s2 + $0x1] sm:$0x1] %vm152_vm2, %v162_v3 }

</bundles_post_ra>
